<compile_context>
chip_gen: v6e
topology: v6e:2x2x1
jax: 0.10.0
libtpu: 0.0.40
codegen_flags: <defaults>
</compile_context>

<pallas_src>
import functools

import jax
import jax.numpy as jnp
import numpy as np
from jax.experimental import pallas as pl
from jax.experimental.pallas import tpu as pltpu

KS = 3                      # kernel_size (odd)
PAD = (KS - 1) // 2         # reflection pad width = 1
EPS = 1e-5                  # nn.InstanceNorm2d default eps (affine=False)


def resblock_kernel(x_ref, w1_ref, b1_ref, w2_ref, b2_ref, o_ref, *, H, W):
    """One batch element, lane-dense layout.

    x_ref / o_ref : (C, H*W) f32   activations, H*W on the 128-lane axis
    w*_ref        : (C, 9*C) f32   conv weights, taps concatenated along K
    b*_ref        : (C, 1)   f32
    """
    C, HW = x_ref.shape

    # Reflection-seam masks from a (1, H*W) iota; broadcast happens inside
    # jnp.where (review: avoid a (C, H*W) int32 iota + masks).
    lane = jax.lax.broadcasted_iota(jnp.int32, (1, HW), 1)
    if (W & (W - 1)) == 0:                       # power-of-two: no integer rem
        col = jnp.bitwise_and(lane, W - 1)
    else:
        col = lane % W
    col_first = col == 0                         # image column 0
    col_last = col == (W - 1)                    # image column W-1
    row_first = lane < W                         # image row 0
    row_last = lane >= (H - 1) * W               # image row H-1

    def shift(v, s):
        """Circular lane shift: out[:, p] = v[:, (p - s) % HW]  (static s)."""
        s = s % HW
        if s == 0:
            return v
        return jnp.concatenate([v[:, HW - s:], v[:, :HW - s]], axis=1)

    def conv3x3_relu(act, w_ref, b_ref):
        # Row taps dr = -1 / 0 / +1: +/-W lane shifts; reflection fixes only
        # the first / last image row (padded row -1 -> row 1, row H -> H-2).
        up = shift(act, W)        # [p] = act[p - W]  == padded(r-1, c) for r >= 1
        dn = shift(act, -W)       # [p] = act[p + W]  == padded(r+1, c) for r <= H-2
        row_taps = (
            jnp.where(row_first, dn, up),     # dr = -1
            act,                              # dr =  0
            jnp.where(row_last, up, dn),      # dr = +1
        )
        # Column taps dc = -1 / 0 / +1 from +/-1 lane shifts of each row tap;
        # reflection fix only at the W-column seams (these seams also cover the
        # circular wrap-around lanes of the shift).
        taps = []
        for t in row_taps:
            tl = shift(t, 1)      # [p] = t[p - 1]  == column c-1 away from seam
            tr = shift(t, -1)     # [p] = t[p + 1]  == column c+1 away from seam
            taps.append(jnp.where(col_first, tr, tl))   # dc = -1
            taps.append(t)                              # dc =  0
            taps.append(jnp.where(col_last, tl, tr))    # dc = +1
        # Single MXU matmul per conv: (C, 9C) @ (9C, H*W), f32 accumulation.
        # (For very large C*H*W, group by dr -> 3 matmuls with K = 3C instead.)
        stacked = jnp.concatenate(taps, axis=0)          # (9*C, H*W)
        acc = jnp.dot(w_ref[...], stacked, preferred_element_type=jnp.float32)
        return jnp.maximum(acc + b_ref[...], 0.0)        # bias + ReLU

    x = x_ref[...]                                       # (C, H*W) f32

    h = conv3x3_relu(x, w1_ref, b1_ref)
    # TODO(synk): Dropout2d(p=0.5) skipped (eval-mode identity).
    h = conv3x3_relu(h, w2_ref, b2_ref)

    # InstanceNorm2d (affine=False): centered two-pass stats in f32 (avoids the
    # E[x^2]-mean^2 cancellation flagged in the review).
    inv_hw = 1.0 / float(HW)
    mean = jnp.sum(h, axis=1, keepdims=True) * inv_hw
    centered = h - mean
    var = jnp.sum(centered * centered, axis=1, keepdims=True) * inv_hw
    rstd = jax.lax.rsqrt(var + EPS)

    # Residual add; full-width lane-dense store straight to the output block.
    o_ref[...] = x + centered * rstd


def resblock_forward(x, w1, b1, w2, b2):
    """x: (N, C, H, W) f32, w*: (C, C, 3, 3), b*: (C,)."""
    N, C, H, W = x.shape
    assert H >= 2 and W >= 2, "ReflectionPad2d(1) requires H, W >= 2"
    HW = H * W

    # (C_out, C_in, kh, kw) -> (C_out, (kh*3 + kw)*C_in + ci): the conv becomes
    # a single matmul against the tap-concatenated activation slab.
    w1k = jnp.transpose(w1, (0, 2, 3, 1)).reshape(C, KS * KS * C).astype(jnp.float32)
    w2k = jnp.transpose(w2, (0, 2, 3, 1)).reshape(C, KS * KS * C).astype(jnp.float32)
    b1k = b1.reshape(C, 1).astype(jnp.float32)
    b2k = b2.reshape(C, 1).astype(jnp.float32)

    # Lane-dense I/O: (N, C, H*W) is a free contiguous reshape in HBM.
    # NOTE: best utilisation when H*W % 128 == 0 (true here: 256); for other
    # production shapes, pad H*W to a multiple of 128 in this wrapper and
    # exclude the pad lanes from the InstanceNorm statistics.
    xf = x.astype(jnp.float32).reshape(N, C, HW)

    kernel = pl.pallas_call(
        functools.partial(resblock_kernel, H=H, W=W),
        out_shape=jax.ShapeDtypeStruct((N, C, HW), jnp.float32),
        grid_spec=pltpu.PrefetchScalarGridSpec(
            num_scalar_prefetch=0,
            grid=(N,),
            in_specs=[
                pl.BlockSpec((None, C, HW), lambda n: (n, 0, 0)),      # x (batch squeezed)
                pl.BlockSpec((C, KS * KS * C), lambda n: (0, 0)),      # w1 (C, 9C)
                pl.BlockSpec((C, 1), lambda n: (0, 0)),                # b1
                pl.BlockSpec((C, KS * KS * C), lambda n: (0, 0)),      # w2 (C, 9C)
                pl.BlockSpec((C, 1), lambda n: (0, 0)),                # b2
            ],
            out_specs=pl.BlockSpec((None, C, HW), lambda n: (n, 0, 0)),
        ),
        compiler_params=pltpu.CompilerParams(
            # N >= 2 keeps both v7x TensorCores busy; sequential loop on v5e/v6e.
            dimension_semantics=("parallel",),
            # Test working set is tiny; production-size images on v7x (64 MiB
            # VMEM) should instead add an H-tile grid axis with a 1-row halo.
            vmem_limit_bytes=64 * 1024 * 1024,
        ),
    )
    return kernel(xf, w1k, b1k, w2k, b2k).reshape(N, C, H, W)


def resblock_reference(x, w1, b1, w2, b2):
    """Pure-JAX reference of the eval-mode forward pass (f32, HIGHEST)."""
    def conv_block(h, w, b):
        hp = jnp.pad(h, ((0, 0), (0, 0), (PAD, PAD), (PAD, PAD)), mode="reflect")
        y = jax.lax.conv_general_dilated(
            hp, w, window_strides=(1, 1), padding="VALID",
            dimension_numbers=("NCHW", "OIHW", "NCHW"),
            precision=jax.lax.Precision.HIGHEST)
        return jnp.maximum(y + b.reshape(1, -1, 1, 1), 0.0)

    h = conv_block(x, w1, b1)
    h = conv_block(h, w2, b2)
    mean = jnp.mean(h, axis=(2, 3), keepdims=True)
    var = jnp.mean((h - mean) ** 2, axis=(2, 3), keepdims=True)
    return x + (h - mean) * jax.lax.rsqrt(var + EPS)


if __name__ == "__main__":
    N, C, H, W = 2, 4, 16, 16
    key = jax.random.PRNGKey(0)
    k_x, k_w1, k_b1, k_w2, k_b2 = jax.random.split(key, 5)

    # Deterministic PyTorch-style init: U(-1/sqrt(fan_in), 1/sqrt(fan_in))
    bound = 1.0 / np.sqrt(C * KS * KS)
    x = jax.random.normal(k_x, (N, C, H, W), jnp.float32)
    w1 = jax.random.uniform(k_w1, (C, C, KS, KS), jnp.float32, -bound, bound)
    b1 = jax.random.uniform(k_b1, (C,), jnp.float32, -bound, bound)
    w2 = jax.random.uniform(k_w2, (C, C, KS, KS), jnp.float32, -bound, bound)
    b2 = jax.random.uniform(k_b2, (C,), jnp.float32, -bound, bound)

    out = resblock_forward(x, w1, b1, w2, b2)
    out = jax.block_until_ready(out)

    ref = resblock_reference(x, w1, b1, w2, b2)
    max_err = float(jnp.max(jnp.abs(out - ref)))
    assert out.shape == (N, C, H, W), out.shape
    # f32 MXU operands + f32 accumulation: tight tolerance is now appropriate.
    assert max_err < 2e-3, f"max abs err too large: {max_err}"
    print("KERNEL_OK")
</pallas_src>

<mosaic_0001>
module attributes {stable_mosaic.version = 11 : i64} {
  func.func @resblock_kernel(%arg0: i32, %arg1: memref<1x4x256xf32, #tpu.memory_space<vmem>>, %arg2: memref<4x36xf32, #tpu.memory_space<vmem>>, %arg3: memref<4x1xf32, #tpu.memory_space<vmem>>, %arg4: memref<4x36xf32, #tpu.memory_space<vmem>>, %arg5: memref<4x1xf32, #tpu.memory_space<vmem>>, %arg6: memref<1x4x256xf32, #tpu.memory_space<vmem>>) attributes {dimension_semantics = [#tpu.dimension_semantics<parallel>], iteration_bounds = array<i64: 2>, scalar_prefetch = 0 : i64, scratch_operands = 0 : i64, tpu.core_type = #tpu.core_type<tc>, window_params = [{transform_indices = @transform_0, window_bounds = array<i64: 1, 4, 256>}, {pipeline_mode = #tpu.pipeline_mode<synchronous>, transform_indices = @transform_1, window_bounds = array<i64: 4, 36>}, {pipeline_mode = #tpu.pipeline_mode<synchronous>, transform_indices = @transform_2, window_bounds = array<i64: 4, 1>}, {pipeline_mode = #tpu.pipeline_mode<synchronous>, transform_indices = @transform_3, window_bounds = array<i64: 4, 36>}, {pipeline_mode = #tpu.pipeline_mode<synchronous>, transform_indices = @transform_4, window_bounds = array<i64: 4, 1>}, {transform_indices = @transform_5, window_bounds = array<i64: 1, 4, 256>}]} {
    %0 = tpu.iota {dimensions = array<i32: 1>} : vector<1x256xi32>
    %c15_i32 = arith.constant 15 : i32
    %1 = vector.broadcast %c15_i32 : i32 to vector<1x256xi32>
    %2 = arith.andi %0, %1 : vector<1x256xi32>
    %c0_i32 = arith.constant 0 : i32
    %3 = vector.broadcast %c0_i32 : i32 to vector<1x256xi32>
    %4 = arith.cmpi eq, %2, %3 : vector<1x256xi32>
    %c15_i32_0 = arith.constant 15 : i32
    %5 = vector.broadcast %c15_i32_0 : i32 to vector<1x256xi32>
    %6 = arith.cmpi eq, %2, %5 : vector<1x256xi32>
    %c16_i32 = arith.constant 16 : i32
    %7 = vector.broadcast %c16_i32 : i32 to vector<1x256xi32>
    %8 = arith.cmpi slt, %0, %7 : vector<1x256xi32>
    %c240_i32 = arith.constant 240 : i32
    %9 = vector.broadcast %c240_i32 : i32 to vector<1x256xi32>
    %10 = arith.cmpi sge, %0, %9 : vector<1x256xi32>
    %c0 = arith.constant 0 : index
    %c0_1 = arith.constant 0 : index
    %c0_2 = arith.constant 0 : index
    %11 = vector.load %arg1[%c0, %c0_1, %c0_2] : memref<1x4x256xf32, #tpu.memory_space<vmem>>, vector<1x4x256xf32>
    %12 = vector.shape_cast %11 : vector<1x4x256xf32> to vector<4x256xf32>
    %13 = vector.extract_strided_slice %12 {offsets = [0, 240], sizes = [4, 16], strides = [1, 1]} : vector<4x256xf32> to vector<4x16xf32>
    %14 = vector.extract_strided_slice %12 {offsets = [0, 0], sizes = [4, 240], strides = [1, 1]} : vector<4x256xf32> to vector<4x240xf32>
    %15 = tpu.concatenate %13, %14 in 1 : vector<4x16xf32>, vector<4x240xf32> -> vector<4x256xf32>
    %16 = vector.extract_strided_slice %12 {offsets = [0, 16], sizes = [4, 240], strides = [1, 1]} : vector<4x256xf32> to vector<4x240xf32>
    %17 = vector.extract_strided_slice %12 {offsets = [0, 0], sizes = [4, 16], strides = [1, 1]} : vector<4x256xf32> to vector<4x16xf32>
    %18 = tpu.concatenate %16, %17 in 1 : vector<4x240xf32>, vector<4x16xf32> -> vector<4x256xf32>
    %19 = vector.shape_cast %8 : vector<1x256xi1> to vector<1x256xi1>
    %20 = vector.broadcast %19 : vector<1x256xi1> to vector<4x256xi1>
    %21 = arith.select %20, %18, %15 : vector<4x256xi1>, vector<4x256xf32>
    %22 = vector.shape_cast %10 : vector<1x256xi1> to vector<1x256xi1>
    %23 = vector.broadcast %22 : vector<1x256xi1> to vector<4x256xi1>
    %24 = arith.select %23, %15, %18 : vector<4x256xi1>, vector<4x256xf32>
    %25 = vector.extract_strided_slice %21 {offsets = [0, 255], sizes = [4, 1], strides = [1, 1]} : vector<4x256xf32> to vector<4x1xf32>
    %26 = vector.extract_strided_slice %21 {offsets = [0, 0], sizes = [4, 255], strides = [1, 1]} : vector<4x256xf32> to vector<4x255xf32>
    %27 = tpu.concatenate %25, %26 in 1 : vector<4x1xf32>, vector<4x255xf32> -> vector<4x256xf32>
    %28 = vector.extract_strided_slice %21 {offsets = [0, 1], sizes = [4, 255], strides = [1, 1]} : vector<4x256xf32> to vector<4x255xf32>
    %29 = vector.extract_strided_slice %21 {offsets = [0, 0], sizes = [4, 1], strides = [1, 1]} : vector<4x256xf32> to vector<4x1xf32>
    %30 = tpu.concatenate %28, %29 in 1 : vector<4x255xf32>, vector<4x1xf32> -> vector<4x256xf32>
    %31 = vector.shape_cast %4 : vector<1x256xi1> to vector<1x256xi1>
    %32 = vector.broadcast %31 : vector<1x256xi1> to vector<4x256xi1>
    %33 = arith.select %32, %30, %27 : vector<4x256xi1>, vector<4x256xf32>
    %34 = vector.shape_cast %6 : vector<1x256xi1> to vector<1x256xi1>
    %35 = vector.broadcast %34 : vector<1x256xi1> to vector<4x256xi1>
    %36 = arith.select %35, %27, %30 : vector<4x256xi1>, vector<4x256xf32>
    %37 = vector.extract_strided_slice %12 {offsets = [0, 255], sizes = [4, 1], strides = [1, 1]} : vector<4x256xf32> to vector<4x1xf32>
    %38 = vector.extract_strided_slice %12 {offsets = [0, 0], sizes = [4, 255], strides = [1, 1]} : vector<4x256xf32> to vector<4x255xf32>
    %39 = tpu.concatenate %37, %38 in 1 : vector<4x1xf32>, vector<4x255xf32> -> vector<4x256xf32>
    %40 = vector.extract_strided_slice %12 {offsets = [0, 1], sizes = [4, 255], strides = [1, 1]} : vector<4x256xf32> to vector<4x255xf32>
    %41 = vector.extract_strided_slice %12 {offsets = [0, 0], sizes = [4, 1], strides = [1, 1]} : vector<4x256xf32> to vector<4x1xf32>
    %42 = tpu.concatenate %40, %41 in 1 : vector<4x255xf32>, vector<4x1xf32> -> vector<4x256xf32>
    %43 = vector.shape_cast %4 : vector<1x256xi1> to vector<1x256xi1>
    %44 = vector.broadcast %43 : vector<1x256xi1> to vector<4x256xi1>
    %45 = arith.select %44, %42, %39 : vector<4x256xi1>, vector<4x256xf32>
    %46 = vector.shape_cast %6 : vector<1x256xi1> to vector<1x256xi1>
    %47 = vector.broadcast %46 : vector<1x256xi1> to vector<4x256xi1>
    %48 = arith.select %47, %39, %42 : vector<4x256xi1>, vector<4x256xf32>
    %49 = vector.extract_strided_slice %24 {offsets = [0, 255], sizes = [4, 1], strides = [1, 1]} : vector<4x256xf32> to vector<4x1xf32>
    %50 = vector.extract_strided_slice %24 {offsets = [0, 0], sizes = [4, 255], strides = [1, 1]} : vector<4x256xf32> to vector<4x255xf32>
    %51 = tpu.concatenate %49, %50 in 1 : vector<4x1xf32>, vector<4x255xf32> -> vector<4x256xf32>
    %52 = vector.extract_strided_slice %24 {offsets = [0, 1], sizes = [4, 255], strides = [1, 1]} : vector<4x256xf32> to vector<4x255xf32>
    %53 = vector.extract_strided_slice %24 {offsets = [0, 0], sizes = [4, 1], strides = [1, 1]} : vector<4x256xf32> to vector<4x1xf32>
    %54 = tpu.concatenate %52, %53 in 1 : vector<4x255xf32>, vector<4x1xf32> -> vector<4x256xf32>
    %55 = vector.shape_cast %4 : vector<1x256xi1> to vector<1x256xi1>
    %56 = vector.broadcast %55 : vector<1x256xi1> to vector<4x256xi1>
    %57 = arith.select %56, %54, %51 : vector<4x256xi1>, vector<4x256xf32>
    %58 = vector.shape_cast %6 : vector<1x256xi1> to vector<1x256xi1>
    %59 = vector.broadcast %58 : vector<1x256xi1> to vector<4x256xi1>
    %60 = arith.select %59, %51, %54 : vector<4x256xi1>, vector<4x256xf32>
    %61 = tpu.concatenate %33, %21, %36, %45, %12, %48, %57, %24, %60 in 0 : vector<4x256xf32>, vector<4x256xf32>, vector<4x256xf32>, vector<4x256xf32>, vector<4x256xf32>, vector<4x256xf32>, vector<4x256xf32>, vector<4x256xf32>, vector<4x256xf32> -> vector<36x256xf32>
    %c0_3 = arith.constant 0 : index
    %c0_4 = arith.constant 0 : index
    %62 = vector.load %arg2[%c0_3, %c0_4] : memref<4x36xf32, #tpu.memory_space<vmem>>, vector<4x36xf32>
    %cst = arith.constant dense<0.000000e+00> : vector<4x256xf32>
    %63 = tpu.matmul %62, %61, %cst {dimension_numbers = #tpu.dot_dimension_numbers<[1], [0], [0], [1], [0, 0, 1, 1], [], []>} : vector<4x36xf32>, vector<36x256xf32>, vector<4x256xf32> -> vector<4x256xf32>
    %c0_5 = arith.constant 0 : index
    %c0_6 = arith.constant 0 : index
    %64 = vector.load %arg3[%c0_5, %c0_6] : memref<4x1xf32, #tpu.memory_space<vmem>>, vector<4x1xf32>
    %65 = vector.broadcast %64 : vector<4x1xf32> to vector<4x256xf32>
    %66 = arith.addf %63, %65 : vector<4x256xf32>
    %cst_7 = arith.constant 0.000000e+00 : f32
    %67 = vector.broadcast %cst_7 : f32 to vector<4x256xf32>
    %68 = arith.maximumf %66, %67 : vector<4x256xf32>
    %69 = vector.extract_strided_slice %68 {offsets = [0, 240], sizes = [4, 16], strides = [1, 1]} : vector<4x256xf32> to vector<4x16xf32>
    %70 = vector.extract_strided_slice %68 {offsets = [0, 0], sizes = [4, 240], strides = [1, 1]} : vector<4x256xf32> to vector<4x240xf32>
    %71 = tpu.concatenate %69, %70 in 1 : vector<4x16xf32>, vector<4x240xf32> -> vector<4x256xf32>
    %72 = vector.extract_strided_slice %68 {offsets = [0, 16], sizes = [4, 240], strides = [1, 1]} : vector<4x256xf32> to vector<4x240xf32>
    %73 = vector.extract_strided_slice %68 {offsets = [0, 0], sizes = [4, 16], strides = [1, 1]} : vector<4x256xf32> to vector<4x16xf32>
    %74 = tpu.concatenate %72, %73 in 1 : vector<4x240xf32>, vector<4x16xf32> -> vector<4x256xf32>
    %75 = vector.shape_cast %8 : vector<1x256xi1> to vector<1x256xi1>
    %76 = vector.broadcast %75 : vector<1x256xi1> to vector<4x256xi1>
    %77 = arith.select %76, %74, %71 : vector<4x256xi1>, vector<4x256xf32>
    %78 = vector.shape_cast %10 : vector<1x256xi1> to vector<1x256xi1>
    %79 = vector.broadcast %78 : vector<1x256xi1> to vector<4x256xi1>
    %80 = arith.select %79, %71, %74 : vector<4x256xi1>, vector<4x256xf32>
    %81 = vector.extract_strided_slice %77 {offsets = [0, 255], sizes = [4, 1], strides = [1, 1]} : vector<4x256xf32> to vector<4x1xf32>
    %82 = vector.extract_strided_slice %77 {offsets = [0, 0], sizes = [4, 255], strides = [1, 1]} : vector<4x256xf32> to vector<4x255xf32>
    %83 = tpu.concatenate %81, %82 in 1 : vector<4x1xf32>, vector<4x255xf32> -> vector<4x256xf32>
    %84 = vector.extract_strided_slice %77 {offsets = [0, 1], sizes = [4, 255], strides = [1, 1]} : vector<4x256xf32> to vector<4x255xf32>
    %85 = vector.extract_strided_slice %77 {offsets = [0, 0], sizes = [4, 1], strides = [1, 1]} : vector<4x256xf32> to vector<4x1xf32>
    %86 = tpu.concatenate %84, %85 in 1 : vector<4x255xf32>, vector<4x1xf32> -> vector<4x256xf32>
    %87 = vector.shape_cast %4 : vector<1x256xi1> to vector<1x256xi1>
    %88 = vector.broadcast %87 : vector<1x256xi1> to vector<4x256xi1>
    %89 = arith.select %88, %86, %83 : vector<4x256xi1>, vector<4x256xf32>
    %90 = vector.shape_cast %6 : vector<1x256xi1> to vector<1x256xi1>
    %91 = vector.broadcast %90 : vector<1x256xi1> to vector<4x256xi1>
    %92 = arith.select %91, %83, %86 : vector<4x256xi1>, vector<4x256xf32>
    %93 = vector.extract_strided_slice %68 {offsets = [0, 255], sizes = [4, 1], strides = [1, 1]} : vector<4x256xf32> to vector<4x1xf32>
    %94 = vector.extract_strided_slice %68 {offsets = [0, 0], sizes = [4, 255], strides = [1, 1]} : vector<4x256xf32> to vector<4x255xf32>
    %95 = tpu.concatenate %93, %94 in 1 : vector<4x1xf32>, vector<4x255xf32> -> vector<4x256xf32>
    %96 = vector.extract_strided_slice %68 {offsets = [0, 1], sizes = [4, 255], strides = [1, 1]} : vector<4x256xf32> to vector<4x255xf32>
    %97 = vector.extract_strided_slice %68 {offsets = [0, 0], sizes = [4, 1], strides = [1, 1]} : vector<4x256xf32> to vector<4x1xf32>
    %98 = tpu.concatenate %96, %97 in 1 : vector<4x255xf32>, vector<4x1xf32> -> vector<4x256xf32>
    %99 = vector.shape_cast %4 : vector<1x256xi1> to vector<1x256xi1>
    %100 = vector.broadcast %99 : vector<1x256xi1> to vector<4x256xi1>
    %101 = arith.select %100, %98, %95 : vector<4x256xi1>, vector<4x256xf32>
    %102 = vector.shape_cast %6 : vector<1x256xi1> to vector<1x256xi1>
    %103 = vector.broadcast %102 : vector<1x256xi1> to vector<4x256xi1>
    %104 = arith.select %103, %95, %98 : vector<4x256xi1>, vector<4x256xf32>
    %105 = vector.extract_strided_slice %80 {offsets = [0, 255], sizes = [4, 1], strides = [1, 1]} : vector<4x256xf32> to vector<4x1xf32>
    %106 = vector.extract_strided_slice %80 {offsets = [0, 0], sizes = [4, 255], strides = [1, 1]} : vector<4x256xf32> to vector<4x255xf32>
    %107 = tpu.concatenate %105, %106 in 1 : vector<4x1xf32>, vector<4x255xf32> -> vector<4x256xf32>
    %108 = vector.extract_strided_slice %80 {offsets = [0, 1], sizes = [4, 255], strides = [1, 1]} : vector<4x256xf32> to vector<4x255xf32>
    %109 = vector.extract_strided_slice %80 {offsets = [0, 0], sizes = [4, 1], strides = [1, 1]} : vector<4x256xf32> to vector<4x1xf32>
    %110 = tpu.concatenate %108, %109 in 1 : vector<4x255xf32>, vector<4x1xf32> -> vector<4x256xf32>
    %111 = vector.shape_cast %4 : vector<1x256xi1> to vector<1x256xi1>
    %112 = vector.broadcast %111 : vector<1x256xi1> to vector<4x256xi1>
    %113 = arith.select %112, %110, %107 : vector<4x256xi1>, vector<4x256xf32>
    %114 = vector.shape_cast %6 : vector<1x256xi1> to vector<1x256xi1>
    %115 = vector.broadcast %114 : vector<1x256xi1> to vector<4x256xi1>
    %116 = arith.select %115, %107, %110 : vector<4x256xi1>, vector<4x256xf32>
    %117 = tpu.concatenate %89, %77, %92, %101, %68, %104, %113, %80, %116 in 0 : vector<4x256xf32>, vector<4x256xf32>, vector<4x256xf32>, vector<4x256xf32>, vector<4x256xf32>, vector<4x256xf32>, vector<4x256xf32>, vector<4x256xf32>, vector<4x256xf32> -> vector<36x256xf32>
    %c0_8 = arith.constant 0 : index
    %c0_9 = arith.constant 0 : index
    %118 = vector.load %arg4[%c0_8, %c0_9] : memref<4x36xf32, #tpu.memory_space<vmem>>, vector<4x36xf32>
    %cst_10 = arith.constant dense<0.000000e+00> : vector<4x256xf32>
    %119 = tpu.matmul %118, %117, %cst_10 {dimension_numbers = #tpu.dot_dimension_numbers<[1], [0], [0], [1], [0, 0, 1, 1], [], []>} : vector<4x36xf32>, vector<36x256xf32>, vector<4x256xf32> -> vector<4x256xf32>
    %c0_11 = arith.constant 0 : index
    %c0_12 = arith.constant 0 : index
    %120 = vector.load %arg5[%c0_11, %c0_12] : memref<4x1xf32, #tpu.memory_space<vmem>>, vector<4x1xf32>
    %121 = vector.broadcast %120 : vector<4x1xf32> to vector<4x256xf32>
    %122 = arith.addf %119, %121 : vector<4x256xf32>
    %cst_13 = arith.constant 0.000000e+00 : f32
    %123 = vector.broadcast %cst_13 : f32 to vector<4x256xf32>
    %124 = arith.maximumf %122, %123 : vector<4x256xf32>
    %cst_14 = arith.constant dense<0.000000e+00> : vector<4xf32>
    %125 = vector.multi_reduction <add>, %124, %cst_14 [1] : vector<4x256xf32> to vector<4xf32>
    %126 = vector.shape_cast %125 : vector<4xf32> to vector<4x1xf32>
    %cst_15 = arith.constant 3.906250e-03 : f32
    %127 = vector.broadcast %cst_15 : f32 to vector<4x1xf32>
    %128 = arith.mulf %126, %127 : vector<4x1xf32>
    %129 = vector.broadcast %128 : vector<4x1xf32> to vector<4x256xf32>
    %130 = arith.subf %124, %129 : vector<4x256xf32>
    %131 = arith.mulf %130, %130 : vector<4x256xf32>
    %cst_16 = arith.constant dense<0.000000e+00> : vector<4xf32>
    %132 = vector.multi_reduction <add>, %131, %cst_16 [1] : vector<4x256xf32> to vector<4xf32>
    %133 = vector.shape_cast %132 : vector<4xf32> to vector<4x1xf32>
    %cst_17 = arith.constant 3.906250e-03 : f32
    %134 = vector.broadcast %cst_17 : f32 to vector<4x1xf32>
    %135 = arith.mulf %133, %134 : vector<4x1xf32>
    %cst_18 = arith.constant 9.99999974E-6 : f32
    %136 = vector.broadcast %cst_18 : f32 to vector<4x1xf32>
    %137 = arith.addf %135, %136 : vector<4x1xf32>
    %138 = math.rsqrt %137 : vector<4x1xf32>
    %139 = vector.broadcast %138 : vector<4x1xf32> to vector<4x256xf32>
    %140 = arith.mulf %130, %139 : vector<4x256xf32>
    %141 = arith.addf %12, %140 : vector<4x256xf32>
    %c0_19 = arith.constant 0 : index
    %c0_20 = arith.constant 0 : index
    %c0_21 = arith.constant 0 : index
    %142 = vector.load %arg6[%c0_19, %c0_20, %c0_21] : memref<1x4x256xf32, #tpu.memory_space<vmem>>, vector<1x4x256xf32>
    %143 = vector.shape_cast %142 : vector<1x4x256xf32> to vector<4x256xf32>
    %144 = vector.shape_cast %141 : vector<4x256xf32> to vector<1x4x256xf32>
    tpu.vector_store %arg6[%c0_19, %c0_20, %c0_21], %144 {strides = array<i32>} : memref<1x4x256xf32, #tpu.memory_space<vmem>>, vector<1x4x256xf32>,
    return
  }
  func.func @transform_0(%arg0: i32) -> (i32, i32, i32) {
    %c0_i32 = arith.constant 0 : i32
    %c0_i32_0 = arith.constant 0 : i32
    %c0_i32_1 = arith.constant 0 : i32
    return %arg0, %c0_i32, %c0_i32_0 : i32, i32, i32
  }
  func.func @transform_1(%arg0: i32) -> (i32, i32) {
    %c0_i32 = arith.constant 0 : i32
    %c0_i32_0 = arith.constant 0 : i32
    %c0_i32_1 = arith.constant 0 : i32
    return %c0_i32, %c0_i32_0 : i32, i32
  }
  func.func @transform_2(%arg0: i32) -> (i32, i32) {
    %c0_i32 = arith.constant 0 : i32
    %c0_i32_0 = arith.constant 0 : i32
    %c0_i32_1 = arith.constant 0 : i32
    return %c0_i32, %c0_i32_0 : i32, i32
  }
  func.func @transform_3(%arg0: i32) -> (i32, i32) {
    %c0_i32 = arith.constant 0 : i32
    %c0_i32_0 = arith.constant 0 : i32
    %c0_i32_1 = arith.constant 0 : i32
    return %c0_i32, %c0_i32_0 : i32, i32
  }
  func.func @transform_4(%arg0: i32) -> (i32, i32) {
    %c0_i32 = arith.constant 0 : i32
    %c0_i32_0 = arith.constant 0 : i32
    %c0_i32_1 = arith.constant 0 : i32
    return %c0_i32, %c0_i32_0 : i32, i32
  }
  func.func @transform_5(%arg0: i32) -> (i32, i32, i32) {
    %c0_i32 = arith.constant 0 : i32
    %c0_i32_0 = arith.constant 0 : i32
    %c0_i32_1 = arith.constant 0 : i32
    return %arg0, %c0_i32, %c0_i32_0 : i32, i32, i32
  }
}

</mosaic_0001>

<bundles_post_ra>
// kernel: tpu_custom_call.1
= control target key start
LH: loop header
LB: loop body
LE: loop exit
PB: predicated region body
PF: predicated region fallthrough
CT: control target
= control target key end

     0   :  { %10 = vsyncpa [#allocation3], 0  ;;  %s1408_s0 = inlined_call_operand.hbm [shape: f32[2,4,256], index: 0, kind: input, shape index: {}]   ;;  %s1409_s1 = inlined_call_operand.vmem [shape: f32[4,36], index: 1, kind: input, shape index: {}]   ;;  %s1410_s2 = inlined_call_operand.vmem [shape: f32[4,1], index: 2, kind: input, shape index: {}]   ;;  %s1411_s3 = inlined_call_operand.vmem [shape: f32[4,36], index: 3, kind: input, shape index: {}]   ;;  %s1412_s4 = inlined_call_operand.vmem [shape: f32[4,1], index: 4, kind: input, shape index: {}]   ;;  %s1413_s5 = inlined_call_operand.hbm [shape: f32[2,4,256], index: 5, kind: output, shape index: {}]  }
   0x1   :  { %12 = vsyncpa [#allocation3 + $0x1], 0 }
   0x2   :  { %13 = vsyncpa [#allocation4], 0 }
   0x3   :  { %15 = vsyncpa [#allocation4 + $0x1], 0  ;;  %s1021_s18 = smov 0   ;;  %s1023_s19 = smov 0  }
   0x4   :  { %s1025_s20 = smov 0   ;;  %s1027_s21 = smov 0  }
   0x5 LB: > { %s1042_s22 = sadd.s32 4294967295, %s981_s21   ;;  %s811_s23 = sadd.s32 4294967294, %s981_s21   ;;  %s981_s21 = sphi %s1027_s21, %s1438_s21   ;;  %s977_s20 = sphi %s1025_s20, %s1437_s20   ;;  %s973_s19 = sphi %s1023_s19, %s1436_s19   ;;  %s969_s18 = sphi %s1021_s18, %s1435_s18  }
   0x6   : > { %s1046_s24 = sadd.s32 1, %s981_s21   ;;  %s28_s25 = sadd.s32 1, %s977_s20 }
   0x7   : > { %s25_s26 = ssub.s32 %s981_s21, %s1046_s24  ;;  %p35_p0 = scmp.ne.s32.totalorder %s977_s20, %s973_s19 }
   0x8   : > { %p26_p1 = scmp.eq.s32.totalorder %s25_s26, 0  ;;  %p36_p2 = scmp.eq.s32.totalorder %s981_s21, 0 }
   0x9   : > { %p41_p3 = scmp.ne.s32.totalorder %s973_s19, %s969_s18  ;;  %p42_p4 = scmp.eq.s32.totalorder %s1042_s22, 0 }
   0xa   : > { %s1058_s27 = scalar_select %p26_p1, %s977_s20, %s28_s25  }
   0xb   : > { %p1060_p5 = por %p36_p2, %p35_p0  ;;  %p1064_p6 = por %p42_p4, %p41_p3 }
   0xc   : > { %p149_p7 = scmp.eq.s32.totalorder %s1042_s22, 1  ;;  %p155_p8 = scmp.eq.s32.totalorder %s811_s23, 1 }
   0xd   : > { %s1417_s29 = scalar_select %p1064_p6, 1, 0 }
   0xe   : > { %p845_p10 = scmp.lt.s32.totalorder %s981_s21, 2  ;;  %p1071_p11 = por %p149_p7, %p35_p0 }
   0xf   : > { %p1075_p12 = por %p155_p8, %p41_p3  ;;  %s187_s7 = sand.u32 1, %s977_s20  }
  0x10   : > { %s1418_s30 = scalar_select %p1071_p11, 1, 0 }
  0x11   : > { %s1419_s6 = scalar_select %p1075_p12, 1, 0 }
  0x12   : > { %s831_s8 = sshll.u32 %s981_s21, 7  ;;  %s814_s9 = sshll.u32 %s187_s7, 3 }
  0x13   : > { %s1084_s12 = scalar_lea.hbm %s1408_s0, %s831_s8  ;;  %s191_s13 = scalar_lea.vmem [#allocation2], %s814_s9 }
  0x14   : > { %s199_s14 = sshll.u32 %s191_s13, 4  ;;  %p1088_p13 = pnand %p845_p10, %p1060_p5  ;;  %s1092_s14 = int_to_ptr.vmem [resolvable:$true] %s199_s14 }
  0x15   : > { %s188_s16 = scalar_lea.sflag [#allocation3], %s187_s7  ;;  %s889_s17 = scalar_lea.hbm %s1084_s12, 128 }
  0x16   : > { %p890_p2 = scmp.ne.s32.totalorder %s1084_s12, %s889_s17  ;;  %p891_p3 = pneg %p1088_p13 }
  0x17   : > { %s894_s26 = scalar_lea.hbm %s1408_s0, 256  ;;  %p895_p5 = scmp.lt.s32.totalorder %s1084_s12, %s1408_s0 }
  0x18   : > { %p892_p4 = pnand %p891_p3, %p890_p2  ;;  %p896_p8 = scmp.lt.s32.totalorder %s894_s26, %s889_s17 }
  0x1a   : > { %p893_p7 = pneg %p892_p4  ;;  %p897_p10 = por %p896_p8, %p895_p5 }
  0x1c   : > { %p898_p9 = pnand %p897_p10, %p893_p7 }
  0x1e   : > { %901 = shalt.err (!%p898_p9)
}
  0x1f   : > { %s902_s7 = scalar_lea.vmem %s1092_s14, 128  ;;  %s983_s9 = smov [#allocation2]  }
  0x20   : > { %p903_p0 = scmp.ne.s32.totalorder %s1092_s14, %s902_s7  ;;  %s907_s10 = sshll.u32 %s983_s9, 4  ;;  %s908_s10 = int_to_ptr.vmem [resolvable:$false] %s907_s10 }
  0x21   : > { %s909_s11 = scalar_lea.vmem %s908_s10, 256  ;;  %p910_p4 = scmp.lt.s32.totalorder %s1092_s14, %s908_s10 }
  0x22   : > { %p905_p1 = pnand %p903_p0, %p891_p3  ;;  %p911_p12 = scmp.lt.s32.totalorder %s909_s11, %s902_s7 }
  0x24   : > { %p906_p2 = pneg %p905_p1  ;;  %p912_p11 = por %p911_p12, %p910_p4 }
  0x26   : > { %p913_p6 = pnand %p912_p11, %p906_p2 }
  0x28   : > { %916 = shalt.err (!%p913_p6)
}
  0x29   : > { %840 = dma.hbm_to_vmem [thread:$0]  (!%p1088_p13), %s1084_s12, 128, %s1092_s14, %s188_s16  }
  0x2a   : > { %p1421_p9 = scmp.lt.s32.totalorder %s981_s21, 3  ;;  %p1422_p7 = scmp.ge.s32.totalorder %s981_s21, 1 }
  0x2c   : > { %p205_p0 = pnand %p1422_p7, %p1421_p9 }
  0x2d   : > { %s1119_s13 = sand.u32 (!%p205_p0), 1, %s973_s19   ;;  %p1423_p6 = scmp.ne.s32.totalorder (!%p205_p0), %s1417_s29, 0 }
  0x2e   : > { %208 = sbr.rel (%p205_p0) target bundleno = 1286 (0x506), region = 40  ;;  %s818_s17 = sshll.u32 (!%p205_p0), %s1119_s13, 3 }
  0x2f   : > { %s211_s23 = scalar_lea.sflag (!%p205_p0), [#allocation3], %s1119_s13  ;;  %s214_s15 = scalar_lea.vmem (!%p205_p0), [#allocation2], %s818_s17 }
  0x33   : > { %960 = dma.done.wait (%p1423_p6), %s211_s23, 128  }
  0x34   : > { %962 = vsyncadd (%p1423_p6), %s211_s23, 4294967168  ;;  %v1129_v0 = vld [vmem:[%s214_s15] sm:$0xff]  ;;  %s984_s12 = smov 112   ;;  %s985_s14 = smov 16   ;;  %v241_v2 = vlaneseq  ;;  %vm271_vm0 = vcmask 916480   ;;  %vm262_vm1 = vcmask 130048  }
  0x35   : > { %267 = vrot.lane.b32.xlu1 %v1129_v0, %s984_s12  ;;  %v1135_v1 = vcombine.high %v1129_v0, %v1129_v0  ;;  %s986_s29 = smov 1   ;;  %s987_s16 = smov 127   ;;  %v988_v14 = vmov 0.0   ;;  %v989_v16 = vmov 0   ;;  %v400_v17 = vld [vmem:[%s1410_s2] sm:$0xf] }
  0x36   : > { %v1151_v3 = vand.u32 127, %v241_v2  ;;  %480 = vmatprep.mubr.f32.mxu0 %v988_v14  ;;  %691 = vmatprep.mubr.f32.mxu1 %v988_v14  ;;  %vm296_vm4 = vcmask 7168   ;;  %vm305_vm5 = vcmask 1039360   ;;  %vm390_vm10 = vcmask 1043456   ;;  %v611_v30 = vld [vmem:[%s1411_s3] sm:$0xf] }
  0x37   : > { %257 = vrot.lane.b32.xlu0 %v1135_v1, %s985_s14  ;;  %vm406_vm11 = vcmask 293888   ;;  %s832_s23 = sshll.u32 %s1042_s22, 7  ;;  %s240_s15 = scalar_lea.vmem [#allocation5], %s818_s17 }
  0x38   : > { %v1154_v5 = vadd.s32 128, %v1151_v3  ;;  %vm250_vm3 = vcmp.lt.s32.totalorder %v1151_v3, 16  ;;  %885 = vset.pattern.permute.xlu0 %v989_v16  ;;  %v244_v23 = vand.u32 15, %v1151_v3  ;;  %v399_v16 = vld [vmem:[%s1409_s1] sm:$0xf]  ;;  %s727_s25 = scalar_lea.sflag [#allocation4], %s1119_s13 }
  0x39   : > { %269 = vrot.lane.b32.xlu1 %v1135_v1, %s984_s12  ;;  %p1432_p12 = scmp.ne.s32.totalorder %s1418_s30, 0  ;;  %s990_s28 = smov [#allocation5]  }
  0x3a   : > { %vm253_vm2 = vcmp.ge.s32.totalorder %v1154_v5, 240  ;;  %v245_v20 = vand.u32 15, %v1154_v5  ;;  %vm1200_vm7 = vcmp.eq.s32.totalorder %v244_v23, 15  ;;  %vm1211_vm9 = vcmp.eq.s32.totalorder %v244_v23, 0  ;;  %v612_v5 = vld [vmem:[%s1412_s4] sm:$0xf] }
  0x3b   : > { %260 = vrot.lane.b32.xlu0 %v1129_v0, %s985_s14  ;;  %s921_s22 = sshll.u32 %s990_s28, 4  ;;  %s922_s22 = int_to_ptr.vmem [resolvable:$false] %s921_s22 }
  0x3c   : > { %vm1193_vm6 = vcmp.eq.s32.totalorder %v245_v20, 15  ;;  %vm1207_vm8 = vcmp.eq.s32.totalorder %v245_v20, 0  ;;  %s923_s17 = scalar_lea.vmem %s922_s22, 256 }
  0x3d   : > { %326 = vrot.lane.b32.xlu1 %v1129_v0, %s986_s29 }
  0x3f   : > { %323 = vrot.lane.b32.xlu0 %v1135_v1, %s986_s29 }
  0x41   : > { %334 = vrot.lane.b32.xlu1 %v1135_v1, %s987_s16 }
  0x43   : > { %332 = vrot.lane.b32.xlu0 %v1129_v0, %s987_s16 }
  0xa7   : > { %v268_v4 = vpop.permute.xlu1 %267 }
  0xa9   : > { %v258_v6 = vpop.permute.xlu0 %257 }
  0xab   : > { %v270_v7 = vpop.permute.xlu1 %269 }
  0xac   : > { %v1157_v8 = vsel %vm271_vm0, %v268_v4, %v270_v7  ;;  %v276_v10 = vsel %vm271_vm0, %v270_v7, %v268_v4 }
  0xad   : > { %350 = vrot.lane.b32.xlu1 %v1157_v8, %s986_s29  ;;  %356 = vrot.lane.b32.xlu0 %v1157_v8, %s987_s16  ;;  %v261_v9 = vpop.permute.xlu0 %260  ;;  %v386_v48 = vrot.slane %v1157_v8, 4 }
  0xae   : > { %v1166_v11 = vsel %vm262_vm1, %v261_v9, %v258_v6  ;;  %v266_v13 = vsel %vm262_vm1, %v258_v6, %v261_v9 }
  0xaf   : > { %v288_v12 = vsel %vm253_vm2, %v1166_v11, %v276_v10  ;;  %v1178_v15 = vsel %vm250_vm3, %v1157_v8, %v266_v13  ;;  %v327_v18 = vpop.permute.xlu1 %326  ;;  %v370_v8 = vrot.slane %v1166_v11, 4 }
  0xb0   : > { %v387_v35 = vrot.slane %v288_v12, 4  ;;  %v369_v13 = vrot.slane %v1178_v15, 4 }
  0xb1   : > { %358 = vrot.lane.b32.xlu1 %v288_v12, %s987_s16  ;;  %346 = vrot.lane.b32.xlu0 %v288_v12, %s986_s29  ;;  %v324_v19 = vpop.permute.xlu0 %323 }
  0xb2   : > { %v328_v25 = vsel %vm296_vm4, %v327_v18, %v324_v19  ;;  %v331_v29 = vsel %vm296_vm4, %v324_v19, %v327_v18 }
  0xb3   : > { %v335_v21 = vpop.permute.xlu1 %334 }
  0xb5   : > { %294 = vrot.lane.b32.xlu1 %v1178_v15, %s986_s29  ;;  %290 = vrot.lane.b32.xlu0 %v1166_v11, %s986_s29  ;;  %v333_v22 = vpop.permute.xlu0 %332 }
  0xb6   : > { %v340_v26 = vsel %vm305_vm5, %v335_v21, %v333_v22  ;;  %v336_v31 = vsel %vm305_vm5, %v333_v22, %v335_v21 }
  0xb7   : > { %v344_v32 = vsel %vm1193_vm6, %v328_v25, %v340_v26  ;;  %v343_v36 = vsel %vm1200_vm7, %v331_v29, %v336_v31  ;;  %v341_v53 = vsel %vm1211_vm9, %v336_v31, %v331_v29  ;;  %v342_v54 = vsel %vm1207_vm8, %v340_v26, %v328_v25 }
  0xb8   : > { %v383_v37 = vrot.slane %v344_v32, 4  ;;  %v382_v49 = vrot.slane %v343_v36, 4  ;;  %v375_v58 = vrot.slane %v341_v53, 4  ;;  %v376_v59 = vrot.slane %v342_v54, 4 }
  0xb9   : > { %303 = vrot.lane.b32.xlu1 %v1166_v11, %s987_s16  ;;  %301 = vrot.lane.b32.xlu0 %v1178_v15, %s987_s16 }
  0xba   : > { %v396_v56 = vsel %vm390_vm10, %v1135_v1, %v383_v37  ;;  %v395_v57 = vsel %vm390_vm10, %v1129_v0, %v382_v49 }
  0xbd   : > { %403 = vperm.xlu0 %885, %v400_v17  }
 0x11f   : > { %v351_v27 = vpop.permute.xlu1 %350  ;;  %v357_v28 = vpop.permute.xlu0 %356 }
 0x123   : > { %v359_v38 = vpop.permute.xlu1 %358  ;;  %v347_v39 = vpop.permute.xlu0 %346 }
 0x124   : > { %v360_v40 = vsel %vm305_vm5, %v357_v28, %v359_v38  ;;  %v364_v41 = vsel %vm305_vm5, %v359_v38, %v357_v28  ;;  %v352_v42 = vsel %vm296_vm4, %v351_v27, %v347_v39  ;;  %v355_v43 = vsel %vm296_vm4, %v347_v39, %v351_v27 }
 0x125   : > { %v368_v44 = vsel %vm1193_vm6, %v352_v42, %v364_v41  ;;  %v367_v45 = vsel %vm1200_vm7, %v355_v43, %v360_v40  ;;  %v366_v46 = vsel %vm1207_vm8, %v364_v41, %v352_v42  ;;  %v365_v47 = vsel %vm1211_vm9, %v360_v40, %v355_v43 }
 0x126   : > { %820 = vmatprep.subr.msk.mxu0 %vm390_vm10, %v368_v44  ;;  %v398_v50 = vsel %vm390_vm10, %v366_v46, %v387_v35  ;;  %v397_v55 = vsel %vm390_vm10, %v365_v47, %v386_v48 }
 0x127   : > { %v295_v51 = vpop.permute.xlu1 %294  ;;  %821 = vmatpush1.msk.msra.mxu0 %vm390_vm10, %v367_v45  ;;  %v291_v52 = vpop.permute.xlu0 %290 }
 0x128   : > { %440 = vmatprep.subr.mxu0 %v398_v50  ;;  %v297_v62 = vsel %vm296_vm4, %v295_v51, %v291_v52  ;;  %v300_v63 = vsel %vm296_vm4, %v291_v52, %v295_v51 }
 0x129   : > { %441 = vmatpush1.msra.mxu0 %v397_v55 }
 0x12a   : > { %442 = vmatprep.subr.mxu0 %v396_v56 }
 0x12b   : > { %v304_v60 = vpop.permute.xlu1 %303  ;;  %443 = vmatpush1.msra.mxu0 %v395_v57  ;;  %v302_v61 = vpop.permute.xlu0 %301 }
 0x12c   : > { %v306_v2 = vsel %vm305_vm5, %v302_v61, %v304_v60  ;;  %v310_v4 = vsel %vm305_vm5, %v304_v60, %v302_v61 }
 0x12d   : > { %v322_v1 = vsel %vm1193_vm6, %v297_v62, %v310_v4  ;;  %v321_v6 = vsel %vm1200_vm7, %v300_v63, %v306_v2  ;;  %v316_v7 = vsel %vm1207_vm8, %v310_v4, %v297_v62  ;;  %v315_v12 = vsel %vm1211_vm9, %v306_v2, %v300_v63 }
 0x12e   : > { %v394_v9 = vsel %vm390_vm10, %v322_v1, %v376_v59  ;;  %v393_v10 = vsel %vm390_vm10, %v321_v6, %v375_v58  ;;  %v392_v14 = vsel %vm390_vm10, %v316_v7, %v370_v8  ;;  %v391_v11 = vsel %vm390_vm10, %v315_v12, %v369_v13 }
 0x12f   : > { %444 = vmatprep.subr.mxu0 %v394_v9 }
 0x130   : > { %445 = vmatpush1.msra.mxu0 %v393_v10 }
 0x131   : > { %446 = vmatprep.subr.mxu0 %v392_v14 }
 0x132   : > { %447 = vmatpush1.msra.mxu0 %v391_v11 }
 0x133   : > { %822 = vmatmul.mubr.msk.f32.vlgmr.msra.gmra.mxu0 %vm406_vm11, %v399_v16 }
 0x138   : > { %v404_v17 = vpop.permute.xlu0 %403 }
 0x1f3   : > { %v482_v18 = vpop.f32.mrf.mxu0 }
 0x1f4   : > { %v483_v19 = vadd.f32 %v482_v18, %v404_v17 }
 0x1f5   : > { %v484_v20 = vpop.f32.mrf.mxu0 }
 0x1f6   : > { %v1264_v15 = vmax.f32 %v483_v19, 0.0  ;;  %v485_v21 = vadd.f32 %v484_v20, %v404_v17 }
 0x1f8   : > { %500 = vrot.lane.b32.xlu0 %v1264_v15, %s984_s12  ;;  %494 = vrot.lane.b32.xlu1 %v1264_v15, %s985_s14  ;;  %v1270_v22 = vmax.f32 %v485_v21, 0.0 }
 0x1fc   : > { %546 = vrot.lane.b32.xlu0 %v1264_v15, %s987_s16  ;;  %490 = vrot.lane.b32.xlu1 %v1270_v22, %s985_s14 }
 0x200   : > { %537 = vrot.lane.b32.xlu0 %v1270_v22, %s986_s29  ;;  %502 = vrot.lane.b32.xlu1 %v1270_v22, %s984_s12  ;;  %s741_s12 = sshll.u32 %s240_s15, 4  ;;  %s742_s12 = int_to_ptr.vmem [resolvable:$true] %s741_s12 }
 0x201   : > { %s917_s26 = scalar_lea.vmem %s742_s12, 128  ;;  %p924_p3 = scmp.lt.s32.totalorder %s742_s12, %s922_s22 }
 0x202   : > { %p918_p11 = scmp.ne.s32.totalorder %s742_s12, %s917_s26  ;;  %p925_p5 = scmp.lt.s32.totalorder %s923_s17, %s917_s26 }
 0x204   : > { %540 = vrot.lane.b32.xlu1 %v1264_v15, %s986_s29  ;;  %p919_p13 = pnand %p918_p11, %p1432_p12  ;;  %p926_p8 = por %p925_p5, %p924_p3 }
 0x206   : > { %p920_p1 = pneg %p919_p13 }
 0x208   : > { %548 = vrot.lane.b32.xlu1 %v1270_v22, %s987_s16  ;;  %p927_p10 = pnand %p926_p8, %p920_p1 }
 0x26a   : > { %v495_v23 = vpop.permute.xlu1 %494  ;;  %v501_v26 = vpop.permute.xlu0 %500 }
 0x26e   : > { %v491_v25 = vpop.permute.xlu1 %490  ;;  %v547_v38 = vpop.permute.xlu0 %546 }
 0x26f   : > { %v1289_v31 = vsel %vm262_vm1, %v495_v23, %v491_v25  ;;  %v499_v35 = vsel %vm262_vm1, %v491_v25, %v495_v23 }
 0x272   : > { %v503_v27 = vpop.permute.xlu1 %502  ;;  %v538_v3 = vpop.permute.xlu0 %537 }
 0x273   : > { %v504_v28 = vsel %vm271_vm0, %v501_v26, %v503_v27  ;;  %v508_v29 = vsel %vm271_vm0, %v503_v27, %v501_v26 }
 0x274   : > { %570 = vrot.lane.b32.xlu0 %v504_v28, %s987_s16  ;;  %564 = vrot.lane.b32.xlu1 %v504_v28, %s986_s29  ;;  %v512_v32 = vsel %vm253_vm2, %v1289_v31, %v508_v29  ;;  %v1301_v36 = vsel %vm250_vm3, %v504_v28, %v499_v35  ;;  %v599_v60 = vrot.slane %v504_v28, 4 }
 0x275   : > { %v600_v47 = vrot.slane %v512_v32, 4  ;;  %v583_v25 = vrot.slane %v1301_v36, 4 }
 0x276   : > { %v541_v37 = vpop.permute.xlu1 %540 }
 0x277   : > { %v542_v41 = vsel %vm296_vm4, %v541_v37, %v538_v3  ;;  %v545_v46 = vsel %vm296_vm4, %v538_v3, %v541_v37 }
 0x278   : > { %560 = vrot.lane.b32.xlu0 %v512_v32, %s986_s29  ;;  %572 = vrot.lane.b32.xlu1 %v512_v32, %s987_s16 }
 0x27a   : > { %v549_v39 = vpop.permute.xlu1 %548 }
 0x27b   : > { %v554_v40 = vsel %vm305_vm5, %v549_v39, %v547_v38  ;;  %v550_v44 = vsel %vm305_vm5, %v547_v38, %v549_v39 }
 0x27c   : > { %514 = vrot.lane.b32.xlu0 %v1289_v31, %s986_s29  ;;  %518 = vrot.lane.b32.xlu1 %v1301_v36, %s986_s29  ;;  %v558_v45 = vsel %vm1193_vm6, %v542_v41, %v554_v40  ;;  %v557_v48 = vsel %vm1200_vm7, %v545_v46, %v550_v44  ;;  %v555_v1 = vsel %vm1211_vm9, %v550_v44, %v545_v46 }
 0x27d   : > { %v596_v49 = vrot.slane %v558_v45, 4  ;;  %v595_v61 = vrot.slane %v557_v48, 4  ;;  %v556_v6 = vsel %vm1207_vm8, %v554_v40, %v542_v41  ;;  %v589_v10 = vrot.slane %v555_v1, 4 }
 0x27e   : > { %v590_v12 = vrot.slane %v556_v6, 4 }
 0x27f   : > { %v608_v7 = vsel %vm390_vm10, %v1270_v22, %v596_v49  ;;  %v607_v8 = vsel %vm390_vm10, %v1264_v15, %v595_v61  ;;  %v584_v15 = vrot.slane %v1289_v31, 4 }
 0x280   : > { %524 = vrot.lane.b32.xlu0 %v1301_v36, %s987_s16  ;;  %526 = vrot.lane.b32.xlu1 %v1289_v31, %s987_s16  ;;  %s739_s16 = scalar_lea.hbm %s1413_s5, %s832_s23 }
 0x284   : > { %615 = vperm.xlu0 %885, %v612_v5  }
 0x2e6   : > { %v571_v42 = vpop.permute.xlu0 %570  ;;  %v565_v43 = vpop.permute.xlu1 %564 }
 0x2ea   : > { %v561_v50 = vpop.permute.xlu0 %560  ;;  %v573_v51 = vpop.permute.xlu1 %572 }
 0x2eb   : > { %v566_v52 = vsel %vm296_vm4, %v565_v43, %v561_v50  ;;  %v569_v53 = vsel %vm296_vm4, %v561_v50, %v565_v43  ;;  %v574_v54 = vsel %vm305_vm5, %v571_v42, %v573_v51  ;;  %v578_v55 = vsel %vm305_vm5, %v573_v51, %v571_v42 }
 0x2ec   : > { %v582_v56 = vsel %vm1193_vm6, %v566_v52, %v578_v55  ;;  %v581_v57 = vsel %vm1200_vm7, %v569_v53, %v574_v54  ;;  %v580_v58 = vsel %vm1207_vm8, %v578_v55, %v566_v52  ;;  %v579_v59 = vsel %vm1211_vm9, %v574_v54, %v569_v53 }
 0x2ed   : > { %823 = vmatprep.subr.msk.mxu1 %vm390_vm10, %v582_v56  ;;  %v610_v62 = vsel %vm390_vm10, %v580_v58, %v600_v47  ;;  %v609_v4 = vsel %vm390_vm10, %v579_v59, %v599_v60 }
 0x2ee   : > { %v515_v63 = vpop.permute.xlu0 %514  ;;  %824 = vmatpush1.msk.msra.mxu1 %vm390_vm10, %v581_v57  ;;  %v519_v2 = vpop.permute.xlu1 %518 }
 0x2ef   : > { %651 = vmatprep.subr.mxu1 %v610_v62  ;;  %v520_v14 = vsel %vm296_vm4, %v519_v2, %v515_v63  ;;  %v523_v16 = vsel %vm296_vm4, %v515_v63, %v519_v2 }
 0x2f0   : > { %652 = vmatpush1.msra.mxu1 %v609_v4 }
 0x2f1   : > { %653 = vmatprep.subr.mxu1 %v608_v7 }
 0x2f2   : > { %v525_v9 = vpop.permute.xlu0 %524  ;;  %654 = vmatpush1.msra.mxu1 %v607_v8  ;;  %v527_v13 = vpop.permute.xlu1 %526 }
 0x2f3   : > { %v528_v11 = vsel %vm305_vm5, %v525_v9, %v527_v13  ;;  %v532_v17 = vsel %vm305_vm5, %v527_v13, %v525_v9 }
 0x2f4   : > { %v536_v18 = vsel %vm1193_vm6, %v520_v14, %v532_v17  ;;  %v535_v19 = vsel %vm1200_vm7, %v523_v16, %v528_v11  ;;  %v534_v20 = vsel %vm1207_vm8, %v532_v17, %v520_v14  ;;  %v533_v23 = vsel %vm1211_vm9, %v528_v11, %v523_v16 }
 0x2f5   : > { %v606_v21 = vsel %vm390_vm10, %v536_v18, %v590_v12  ;;  %v605_v22 = vsel %vm390_vm10, %v535_v19, %v589_v10  ;;  %v604_v24 = vsel %vm390_vm10, %v534_v20, %v584_v15  ;;  %v603_v33 = vsel %vm390_vm10, %v533_v23, %v583_v25 }
 0x2f6   : > { %655 = vmatprep.subr.mxu1 %v606_v21 }
 0x2f7   : > { %656 = vmatpush1.msra.mxu1 %v605_v22 }
 0x2f8   : > { %657 = vmatprep.subr.mxu1 %v604_v24 }
 0x2f9   : > { %658 = vmatpush1.msra.mxu1 %v603_v33 }
 0x2fa   : > { %825 = vmatmul.mubr.msk.f32.vlgmr.msra.gmra.mxu1 %vm406_vm11, %v611_v30 }
 0x2ff   : > { %v616_v26 = vpop.permute.xlu0 %615 }
 0x3ba   : > { %v693_v27 = vpop.f32.mrf.mxu1 }
 0x3bb   : > { %v694_v34 = vadd.f32 %v693_v27, %v616_v26 }
 0x3bc   : > { %v695_v28 = vpop.f32.mrf.mxu1 }
 0x3bd   : > { %v698_v29 = vmax.f32 %v694_v34, 0.0  ;;  %v696_v31 = vadd.f32 %v695_v28, %v616_v26 }
 0x3bf   : > { %v699_v32 = vmax.f32 %v696_v31, 0.0  ;;  %v700_v35 = vsel %vm390_vm10, %v698_v29, 0.0 }
 0x3c1   : > { %v701_v36 = vsel %vm390_vm10, %v699_v32, 0.0 }
 0x3c2   : > { %v702_v5 = vadd.f32 %v701_v36, %v700_v35 }
 0x3c4   : > { %703 = vadd.xlane.f32.xlu1 %v702_v5 }
 0x44d   : > { %v704_v37 = vpop.xlane.xlu1 %703 }
 0x44e   : > { %v705_v38 = vmul.f32 0.00390625, %v704_v37 }
 0x450   : > { %v706_v39 = vsub.f32 %v698_v29, %v705_v38  ;;  %v707_v3 = vsub.f32 %v699_v32, %v705_v38 }
 0x452   : > { %v708_v40 = vmul.f32 %v706_v39, %v706_v39  ;;  %v709_v41 = vmul.f32 %v707_v3, %v707_v3 }
 0x454   : > { %v710_v42 = vsel %vm390_vm10, %v708_v40, 0.0  ;;  %v711_v43 = vsel %vm390_vm10, %v709_v41, 0.0 }
 0x455   : > { %v712_v44 = vadd.f32 %v711_v43, %v710_v42 }
 0x457   : > { %713 = vadd.xlane.f32.xlu0 %v712_v44 }
 0x4e0   : > { %v714_v45 = vpop.xlane.xlu0 %713 }
 0x4e1   : > { %v715_v46 = vmul.f32 0.00390625, %v714_v45 }
 0x4e3   : > { %v716_v47 = vadd.f32 1e-05, %v715_v46 }
 0x4e5   : > { %887 = vrsqrt.f32 %v716_v47 }
 0x4f2   : > { %v888_v48 = vpop.eup %887 }
 0x4f3   : > { %v718_v49 = vmul.f32 %v888_v48, %v706_v39  ;;  %v719_v50 = vmul.f32 %v888_v48, %v707_v3 }
 0x4f5   : > { %v722_v51 = vcombine.low %v718_v49, %v719_v50 }
 0x4f7   : > { %v724_v52 = vadd.f32 %v722_v51, %v1129_v0 }
 0x4f9   : > { %725 = vst [vmem:[%s240_s15] sm:$0xff] %v724_v52 }
 0x4fa   : > { %930 = shalt.err (!%p927_p10)
}
 0x4fb   : > { %s931_s8 = scalar_lea.hbm %s739_s16, 128  ;;  %s935_s9 = scalar_lea.hbm %s1413_s5, 256 }
 0x4fc   : > { %p932_p2 = scmp.ne.s32.totalorder %s739_s16, %s931_s8  ;;  %p936_p7 = scmp.lt.s32.totalorder %s739_s16, %s1413_s5 }
 0x4fd   : > { %p937_p0 = scmp.lt.s32.totalorder %s935_s9, %s931_s8 }
 0x4fe   : > { %p933_p4 = pnand %p932_p2, %p1432_p12 }
 0x4ff   : > { %p938_p6 = por %p937_p0, %p936_p7 }
 0x500   : > { %p934_p9 = pneg %p933_p4 }
 0x502   : > { %p939_p11 = pnand %p938_p6, %p934_p9 }
 0x504   : > { %942 = shalt.err (!%p939_p11)
}
 0x505   : > { %835 = dma.vmem_to_hbm [thread:$0]  (%p1432_p12), %s742_s12, 128, %s739_s16, %s727_s25  }
 0x506 PF: > { %s753_s23 = sand.u32 1, %s969_s18   ;;  %p1433_p13 = scmp.ne.s32.totalorder %s1419_s6, 0 }
 0x507   : > { %p1434_p1 = scmp.ge.s32.totalorder %s981_s21, 2  ;;  %s754_s15 = scalar_lea.sflag [#allocation4], %s753_s23 }
 0x509   : > { %p842_p3 = pnand %p1434_p1, %p1433_p13 }
 0x50b   : > { %p843_p5 = pneg %p842_p3 }
 0x50d   : > { %964 = dma.done.wait (%p843_p5), %s754_s15, 128  }
 0x50e   : > { %966 = vsyncadd (%p843_p5), %s754_s15, 4294967168  ;;  %p18_p8 = scmp.ge.s32.totalorder %s1046_s24, 4   ;;  %s1435_s18 = smov %s973_s19 }
 0x50f   : > { %s1436_s19 = smov %s977_s20  ;;  %s1437_s20 = smov %s1058_s27 }
 0x510   : > { %s1438_s21 = smov %s1046_s24  ;;  %20 = sbr.rel (!%p18_p8) target bundleno = 5 (0x5), region = 85 }
 0x515   :  { %759 = vsyncpa [#allocation3], 1 }
 0x516   :  { %761 = vsyncpa [#allocation3 + $0x1], 1 }
 0x517   :  { %762 = vsyncpa [#allocation4], 1 }
 0x518   :  { %764 = vsyncpa [#allocation4 + $0x1], 1 }

</bundles_post_ra>
